<compile_context>
chip_gen: v5e
topology: v5e:2x2
jax: 0.10.0
libtpu: 0.0.40
codegen_flags: <defaults>
</compile_context>

<pallas_src>
import numpy as np
import jax
import jax.numpy as jnp
from jax import lax
from jax.experimental import pallas as pl
from jax.experimental.pallas import tpu as pltpu


def _round_up(x, m):
    return (x + m - 1) // m * m


def simple_cat_tgt_masked_kernel(ids_ref, tgt_ref, mask_ref, wemb_ref,
                                 temb_ref, memb_ref, out_ref, acc_ref):
    k = pl.program_id(1)
    nk = pl.num_programs(1)

    rows = ids_ref.shape[0]
    v_tile, D = wemb_ref.shape
    Dm = memb_ref.shape[1]
    out_w = out_ref.shape[1]

    @pl.when(k == 0)
    def _():
        acc_ref[...] = jnp.zeros_like(acc_ref)

    # ---- word-embedding lookup: one-hot matmul on the MXU, V-tiled ----
    ids = ids_ref[...]                                          # (rows, 1) int32
    col = lax.broadcasted_iota(jnp.int32, (rows, v_tile), 1) + k * v_tile
    onehot = (ids == col).astype(jnp.float32)                   # (rows, v_tile)
    acc_ref[...] += jnp.dot(onehot, wemb_ref[...],
                            preferred_element_type=jnp.float32)  # (rows, D)

    @pl.when(k == nk - 1)
    def _():
        sent_vec = acc_ref[...]                                  # (rows, D)

        # ---- replace the target row with target_emb ----
        is_tgt = tgt_ref[...] == 1                               # (rows, 1)
        sent_vec = jnp.where(is_tgt, temb_ref[...], sent_vec)    # (rows, D)

        # dropout -> identity (inference mode)

        # ---- mask embedding lookup (table only has rows 0 and 1) ----
        mask_vec = jnp.where(mask_ref[...] == 1,
                             memb_ref[1:2, :], memb_ref[0:1, :])  # (rows, Dm)

        # ---- single lane-dense store (sent | mask | zero pad) ----
        parts = [sent_vec, mask_vec]
        pad_w = out_w - D - Dm
        if pad_w > 0:
            parts.append(jnp.zeros((rows, pad_w), jnp.float32))
        out_ref[...] = jnp.concatenate(parts, axis=-1)


def simple_cat_tgt_masked(sent, mask, word_embed, target_emb, mask_embed):
    B, L = sent.shape
    V, D = word_embed.shape
    Dm = mask_embed.shape[1]
    N = B * L

    # ---- wrapper-side prep (layout plumbing, per-sentence argmax) ----
    tidx = jnp.argmax(mask, axis=1).astype(jnp.int32)            # (B,)
    is_tgt = (jnp.arange(L, dtype=jnp.int32)[None, :]
              == tidx[:, None]).astype(jnp.int32)                # (B, L)

    ids_col = sent.reshape(N, 1).astype(jnp.int32)               # sublane-major
    mask_col = mask.reshape(N, 1).astype(jnp.int32)
    tgt_col = is_tgt.reshape(N, 1)

    # Row tiling: batch up to 256 rows per grid step.
    row_tile = min(256, _round_up(N, 8))
    n_pad = _round_up(N, row_tile)
    if n_pad != N:
        rpad = ((0, n_pad - N), (0, 0))
        ids_col = jnp.pad(ids_col, rpad)
        mask_col = jnp.pad(mask_col, rpad)
        tgt_col = jnp.pad(tgt_col, rpad)

    # Vocab tiling: the table is streamed as (v_tile, D) blocks over a
    # reduction grid axis instead of being held fully resident in VMEM.
    v_tile = min(512, _round_up(V, 8))
    v_pad = _round_up(V, v_tile)
    wemb = word_embed
    if v_pad != V:
        wemb = jnp.pad(word_embed, ((0, v_pad - V), (0, 0)))

    # Lane-dense output: pad feature dim to a multiple of 128, slice outside.
    out_w = _round_up(D + Dm, 128)

    grid = (n_pad // row_tile, v_pad // v_tile)

    out_padded = pl.pallas_call(
        simple_cat_tgt_masked_kernel,
        out_shape=jax.ShapeDtypeStruct((n_pad, out_w), jnp.float32),
        grid_spec=pltpu.PrefetchScalarGridSpec(
            num_scalar_prefetch=0,
            grid=grid,
            in_specs=[
                pl.BlockSpec((row_tile, 1), lambda i, k: (i, 0)),   # token ids
                pl.BlockSpec((row_tile, 1), lambda i, k: (i, 0)),   # is-target flag
                pl.BlockSpec((row_tile, 1), lambda i, k: (i, 0)),   # mask value
                pl.BlockSpec((v_tile, D), lambda i, k: (k, 0)),     # word-embed tile
                pl.BlockSpec((1, D), lambda i, k: (0, 0)),          # target embedding
                pl.BlockSpec((2, Dm), lambda i, k: (0, 0)),         # mask embedding
            ],
            out_specs=pl.BlockSpec((row_tile, out_w), lambda i, k: (i, 0)),
            scratch_shapes=[pltpu.VMEM((row_tile, D), jnp.float32)],
        ),
        compiler_params=pltpu.CompilerParams(
            dimension_semantics=("parallel", "arbitrary")),
    )(ids_col, tgt_col, mask_col, wemb, target_emb.reshape(1, D), mask_embed)

    return out_padded[:N, :D + Dm].reshape(B, L, D + Dm)


if __name__ == "__main__":
    # Small config consistent with the module: embed_num=32, embed_dim=32,
    # mask_dim=16, batch=2, max_len=8.
    B, L, V, D, Dm = 2, 8, 32, 32, 16

    key = jax.random.PRNGKey(0)
    k_we, k_me, k_te, k_sent = jax.random.split(key, 4)

    word_embed = jax.random.normal(k_we, (V, D), dtype=jnp.float32)    # nn.Embedding init
    mask_embed = jax.random.normal(k_me, (2, Dm), dtype=jnp.float32)   # nn.Embedding(2, mask_dim)
    target_emb = (jax.random.uniform(k_te, (D,), dtype=jnp.float32)
                  * 0.025 - 0.05)                                      # torch.rand(D)*0.025 - 0.05

    sent = jax.random.randint(k_sent, (B, L), 0, V, dtype=jnp.int32)
    # one target token per sentence (positions 3 and 5)
    mask = jnp.zeros((B, L), dtype=jnp.int32)
    mask = mask.at[0, 3].set(1).at[1, 5].set(1)

    out = simple_cat_tgt_masked(sent, mask, word_embed, target_emb, mask_embed)
    out = jax.block_until_ready(out)

    # Plain-JAX reference of the PyTorch forward (eval mode)
    ref_sent = word_embed[sent]                                        # (B, L, D)
    tidx = jnp.argmax(mask, axis=1)
    ref_sent = ref_sent.at[jnp.arange(B), tidx].set(target_emb)
    ref_mask = mask_embed[mask]                                        # (B, L, Dm)
    ref = jnp.concatenate([ref_sent, ref_mask], axis=2)

    np.testing.assert_allclose(np.asarray(out), np.asarray(ref),
                               rtol=1e-5, atol=1e-5)
    print("KERNEL_OK")
</pallas_src>

<mosaic_0001>
module attributes {stable_mosaic.version = 11 : i64} {
  func.func @simple_cat_tgt_masked_kernel(%arg0: i32, %arg1: i32, %arg2: memref<16x1xi32, #tpu.memory_space<vmem>>, %arg3: memref<16x1xi32, #tpu.memory_space<vmem>>, %arg4: memref<16x1xi32, #tpu.memory_space<vmem>>, %arg5: memref<32x32xf32, #tpu.memory_space<vmem>>, %arg6: memref<1x32xf32, #tpu.memory_space<vmem>>, %arg7: memref<2x16xf32, #tpu.memory_space<vmem>>, %arg8: memref<16x128xf32, #tpu.memory_space<vmem>>, %arg9: memref<16x32xf32, #tpu.memory_space<vmem>>) attributes {dimension_semantics = [#tpu.dimension_semantics<parallel>, #tpu.dimension_semantics<arbitrary>], iteration_bounds = array<i64: 1, 1>, scalar_prefetch = 0 : i64, scratch_operands = 1 : i64, tpu.core_type = #tpu.core_type<tc>, window_params = [{transform_indices = @transform_0, window_bounds = array<i64: 16, 1>}, {transform_indices = @transform_1, window_bounds = array<i64: 16, 1>}, {transform_indices = @transform_2, window_bounds = array<i64: 16, 1>}, {transform_indices = @transform_3, window_bounds = array<i64: 32, 32>}, {pipeline_mode = #tpu.pipeline_mode<synchronous>, transform_indices = @transform_4, window_bounds = array<i64: 1, 32>}, {pipeline_mode = #tpu.pipeline_mode<synchronous>, transform_indices = @transform_5, window_bounds = array<i64: 2, 16>}, {transform_indices = @transform_6, window_bounds = array<i64: 16, 128>}]} {
    %c0_i32 = arith.constant 0 : i32
    %0 = arith.cmpi eq, %arg1, %c0_i32 : i32
    %1 = arith.extui %0 : i1 to i32
    %c0_i32_0 = arith.constant 0 : i32
    %2 = arith.cmpi ne, %1, %c0_i32_0 : i32
    scf.if %2 {
      %cst_10 = arith.constant 0.000000e+00 : f32
      %20 = vector.broadcast %cst_10 : f32 to vector<16x32xf32>
      %c0_11 = arith.constant 0 : index
      %c0_12 = arith.constant 0 : index
      %21 = vector.load %arg9[%c0_11, %c0_12] : memref<16x32xf32, #tpu.memory_space<vmem>>, vector<16x32xf32>
      tpu.vector_store %arg9[%c0_11, %c0_12], %20 {strides = array<i32>} : memref<16x32xf32, #tpu.memory_space<vmem>>, vector<16x32xf32>,
    } else {
    }
    %c0 = arith.constant 0 : index
    %c0_1 = arith.constant 0 : index
    %3 = vector.load %arg2[%c0, %c0_1] : memref<16x1xi32, #tpu.memory_space<vmem>>, vector<16x1xi32>
    %4 = tpu.iota {dimensions = array<i32: 1>} : vector<16x32xi32>
    %c32_i32 = arith.constant 32 : i32
    %5 = arith.muli %arg1, %c32_i32 : i32
    %6 = vector.broadcast %5 : i32 to vector<16x32xi32>
    %7 = arith.addi %4, %6 : vector<16x32xi32>
    %8 = vector.broadcast %3 : vector<16x1xi32> to vector<16x32xi32>
    %9 = arith.cmpi eq, %8, %7 : vector<16x32xi32>
    %10 = arith.extui %9 : vector<16x32xi1> to vector<16x32xi32>
    %11 = arith.sitofp %10 : vector<16x32xi32> to vector<16x32xf32>
    %c0_2 = arith.constant 0 : index
    %c0_3 = arith.constant 0 : index
    %12 = vector.load %arg9[%c0_2, %c0_3] : memref<16x32xf32, #tpu.memory_space<vmem>>, vector<16x32xf32>
    %c0_4 = arith.constant 0 : index
    %c0_5 = arith.constant 0 : index
    %13 = vector.load %arg5[%c0_4, %c0_5] : memref<32x32xf32, #tpu.memory_space<vmem>>, vector<32x32xf32>
    %cst = arith.constant dense<0.000000e+00> : vector<16x32xf32>
    %14 = tpu.matmul %11, %13, %cst {dimension_numbers = #tpu.dot_dimension_numbers<[1], [0], [0], [1], [0, 0, 1, 1], [], []>} : vector<16x32xf32>, vector<32x32xf32>, vector<16x32xf32> -> vector<16x32xf32>
    %15 = arith.addf %12, %14 : vector<16x32xf32>
    %c0_6 = arith.constant 0 : index
    %c0_7 = arith.constant 0 : index
    %16 = vector.load %arg9[%c0_6, %c0_7] : memref<16x32xf32, #tpu.memory_space<vmem>>, vector<16x32xf32>
    tpu.vector_store %arg9[%c0_6, %c0_7], %15 {strides = array<i32>} : memref<16x32xf32, #tpu.memory_space<vmem>>, vector<16x32xf32>,
    %c0_i32_8 = arith.constant 0 : i32
    %17 = arith.cmpi eq, %arg1, %c0_i32_8 : i32
    %18 = arith.extui %17 : i1 to i32
    %c0_i32_9 = arith.constant 0 : i32
    %19 = arith.cmpi ne, %18, %c0_i32_9 : i32
    scf.if %19 {
      %c0_10 = arith.constant 0 : index
      %c0_11 = arith.constant 0 : index
      %20 = vector.load %arg9[%c0_10, %c0_11] : memref<16x32xf32, #tpu.memory_space<vmem>>, vector<16x32xf32>
      %c0_12 = arith.constant 0 : index
      %c0_13 = arith.constant 0 : index
      %21 = vector.load %arg3[%c0_12, %c0_13] : memref<16x1xi32, #tpu.memory_space<vmem>>, vector<16x1xi32>
      %c1_i32 = arith.constant 1 : i32
      %22 = vector.broadcast %c1_i32 : i32 to vector<16x1xi32>
      %23 = arith.cmpi eq, %21, %22 : vector<16x1xi32>
      %c0_14 = arith.constant 0 : index
      %c0_15 = arith.constant 0 : index
      %24 = vector.load %arg6[%c0_14, %c0_15] : memref<1x32xf32, #tpu.memory_space<vmem>>, vector<1x32xf32>
      %25 = vector.shape_cast %23 : vector<16x1xi1> to vector<16x1xi1>
      %26 = vector.broadcast %25 : vector<16x1xi1> to vector<16x32xi1>
      %27 = vector.shape_cast %24 : vector<1x32xf32> to vector<1x32xf32>
      %28 = vector.broadcast %27 : vector<1x32xf32> to vector<16x32xf32>
      %29 = arith.select %26, %28, %20 : vector<16x32xi1>, vector<16x32xf32>
      %c0_16 = arith.constant 0 : index
      %c0_17 = arith.constant 0 : index
      %30 = vector.load %arg4[%c0_16, %c0_17] : memref<16x1xi32, #tpu.memory_space<vmem>>, vector<16x1xi32>
      %c1_i32_18 = arith.constant 1 : i32
      %31 = vector.broadcast %c1_i32_18 : i32 to vector<16x1xi32>
      %32 = arith.cmpi eq, %30, %31 : vector<16x1xi32>
      %c1 = arith.constant 1 : index
      %c0_19 = arith.constant 0 : index
      %33 = vector.load %arg7[%c1, %c0_19] : memref<2x16xf32, #tpu.memory_space<vmem>>, vector<1x16xf32>
      %c0_20 = arith.constant 0 : index
      %c0_21 = arith.constant 0 : index
      %34 = vector.load %arg7[%c0_20, %c0_21] : memref<2x16xf32, #tpu.memory_space<vmem>>, vector<1x16xf32>
      %35 = vector.shape_cast %32 : vector<16x1xi1> to vector<16x1xi1>
      %36 = vector.broadcast %35 : vector<16x1xi1> to vector<16x16xi1>
      %37 = vector.shape_cast %33 : vector<1x16xf32> to vector<1x16xf32>
      %38 = vector.broadcast %37 : vector<1x16xf32> to vector<16x16xf32>
      %39 = vector.shape_cast %34 : vector<1x16xf32> to vector<1x16xf32>
      %40 = vector.broadcast %39 : vector<1x16xf32> to vector<16x16xf32>
      %41 = arith.select %36, %38, %40 : vector<16x16xi1>, vector<16x16xf32>
      %cst_22 = arith.constant 0.000000e+00 : f32
      %42 = vector.broadcast %cst_22 : f32 to vector<16x80xf32>
      %43 = tpu.concatenate %29, %41, %42 in 1 : vector<16x32xf32>, vector<16x16xf32>, vector<16x80xf32> -> vector<16x128xf32>
      %c0_23 = arith.constant 0 : index
      %c0_24 = arith.constant 0 : index
      %44 = vector.load %arg8[%c0_23, %c0_24] : memref<16x128xf32, #tpu.memory_space<vmem>>, vector<16x128xf32>
      tpu.vector_store %arg8[%c0_23, %c0_24], %43 {strides = array<i32>} : memref<16x128xf32, #tpu.memory_space<vmem>>, vector<16x128xf32>,
    } else {
    }
    return
  }
  func.func @transform_0(%arg0: i32, %arg1: i32) -> (i32, i32) {
    %c0_i32 = arith.constant 0 : i32
    %c0_i32_0 = arith.constant 0 : i32
    return %arg0, %c0_i32 : i32, i32
  }
  func.func @transform_1(%arg0: i32, %arg1: i32) -> (i32, i32) {
    %c0_i32 = arith.constant 0 : i32
    %c0_i32_0 = arith.constant 0 : i32
    return %arg0, %c0_i32 : i32, i32
  }
  func.func @transform_2(%arg0: i32, %arg1: i32) -> (i32, i32) {
    %c0_i32 = arith.constant 0 : i32
    %c0_i32_0 = arith.constant 0 : i32
    return %arg0, %c0_i32 : i32, i32
  }
  func.func @transform_3(%arg0: i32, %arg1: i32) -> (i32, i32) {
    %c0_i32 = arith.constant 0 : i32
    %c0_i32_0 = arith.constant 0 : i32
    return %arg1, %c0_i32 : i32, i32
  }
  func.func @transform_4(%arg0: i32, %arg1: i32) -> (i32, i32) {
    %c0_i32 = arith.constant 0 : i32
    %c0_i32_0 = arith.constant 0 : i32
    %c0_i32_1 = arith.constant 0 : i32
    return %c0_i32, %c0_i32_0 : i32, i32
  }
  func.func @transform_5(%arg0: i32, %arg1: i32) -> (i32, i32) {
    %c0_i32 = arith.constant 0 : i32
    %c0_i32_0 = arith.constant 0 : i32
    %c0_i32_1 = arith.constant 0 : i32
    return %c0_i32, %c0_i32_0 : i32, i32
  }
  func.func @transform_6(%arg0: i32, %arg1: i32) -> (i32, i32) {
    %c0_i32 = arith.constant 0 : i32
    %c0_i32_0 = arith.constant 0 : i32
    return %arg0, %c0_i32 : i32, i32
  }
}

</mosaic_0001>

<bundles_post_ra>
// kernel: tpu_custom_call.1
= control target key start
LH: loop header
LB: loop body
LE: loop exit
PB: predicated region body
PF: predicated region fallthrough
CT: control target
= control target key end

     0   :  { %v214_v2 = vmov 0   ;;  %s307_s0 = inlined_call_operand.vmem [shape: s32[16,1], index: 0, kind: input, shape index: {}]   ;;  %s308_s1 = inlined_call_operand.vmem [shape: s32[16,1], index: 1, kind: input, shape index: {}]   ;;  %s309_s2 = inlined_call_operand.vmem [shape: s32[16,1], index: 2, kind: input, shape index: {}]   ;;  %s310_s3 = inlined_call_operand.vmem [shape: f32[32,32], index: 3, kind: input, shape index: {}]   ;;  %s311_s4 = inlined_call_operand.vmem [shape: f32[1,32], index: 4, kind: input, shape index: {}]   ;;  %s312_s5 = inlined_call_operand.vmem [shape: f32[2,16], index: 5, kind: input, shape index: {}]   ;;  %s313_s6 = inlined_call_operand.hbm [shape: f32[16,128], index: 6, kind: output, shape index: {}]  }
   0x1   :  { %v31_v0 = vld [vmem:[%s307_s0] sm:$0xff]  ;;  %182 = vset.pattern.permute.xlu0 %v214_v2  ;;  %183 = vset.pattern.permute.xlu1 %v214_v2  ;;  %v55_v3 = vld [vmem:[%s310_s3 + $0x18] sm:$0xff]  ;;  %v54_v4 = vld [vmem:[%s310_s3 + $0x10] sm:$0xff] }
   0x2   :  { %v115_v1 = vld [vmem:[%s309_s2] sm:$0xff]  ;;  %39 = vperm.xlu0 %182, %v31_v0   ;;  %v116_v6 = vld [vmem:[%s309_s2 + $0x8] sm:$0xff]  ;;  %75 = vmatpush.msra.mxu0 %v55_v3 }
   0x3   :  { %vm117_vm0 = vcmp.eq.s32.totalorder %v115_v1, 1  ;;  %v53_v7 = vld [vmem:[%s310_s3 + $0x8] sm:$0xff]  ;;  %172 = vmatpush.msra.mxu1 %v55_v3  ;;  %184 = vset.pattern.permute.xlu2 %v214_v2 }
   0x4   :  { %v121_v5 = vsel %vm117_vm0, 1, %v214_v2  ;;  %76 = vmatpush.msra.mxu0 %v54_v4 }
   0x5   :  { %124 = vperm.xlu1 %183, %v121_v5  }
   0x6   :  { %11 = vsyncpa [#allocation4], 0  ;;  %vm118_vm1 = vcmp.eq.s32.totalorder %v116_v6, 1  ;;  %173 = vmatpush.msra.mxu1 %v54_v4  ;;  %77 = vmatpush.msra.mxu0 %v53_v7  ;;  %v32_v8 = vld [vmem:[%s307_s0 + $0x8] sm:$0xff]  ;;  %v52_v10 = vld [vmem:[%s310_s3] sm:$0xff]  ;;  %vm28_vm2 = vcmask 261120   ;;  %v33_v16 = vlaneseq }
   0x7   :  { %v122_v9 = vsel %vm118_vm1, 1, %v214_v2  ;;  %v215_v11 = vmov 0.0   ;;  %v95_v12 = vld [vmem:[%s308_s1] sm:$0xff]  ;;  %v96_v14 = vld [vmem:[%s308_s1 + $0x8] sm:$0xff]  ;;  %s216_s1 = smov 32   ;;  %vm145_vm10 = vcmask 392192  }
   0x8   :  { %174 = vmatpush.msra.mxu1 %v53_v7  ;;  %78 = vmatpush.msra.mxu0 %v52_v10  ;;  %29 = vst.msk [vmem:[#allocation2] sm:$0xff] %vm28_vm2, %v215_v11  ;;  %vm97_vm3 = vcmp.eq.s32.totalorder %v95_v12, 1  ;;  %vm98_vm4 = vcmp.eq.s32.totalorder %v96_v14, 1  ;;  %v34_v17 = vand.u32 127, %v33_v16  ;;  %v185_v18 = vld [vmem:[%s312_s5 + $0x1] ss:$0 sm:$0xff] }
   0x9   :  { %30 = vst.msk [vmem:[#allocation2 + $0x8] sm:$0xff] %vm28_vm2, %v215_v11  ;;  %v100_v13 = vsel %vm97_vm3, 1, %v214_v2  ;;  %v101_v15 = vsel %vm98_vm4, 1, %v214_v2  ;;  %v186_v19 = vld [vmem:[%s312_s5] ss:$0 sm:$0xff]  ;;  %s217_s19 = smov [#allocation3]  }
   0xa   :  { %42 = vperm.xlu0 %182, %v32_v8   ;;  %175 = vmatpush.msra.mxu1 %v52_v10  ;;  %v187_v33 = vld [vmem:[%s311_s4] ss:$0 sm:$0xff]  ;;  %s154_s20 = sshll.u32 %s217_s19, 4  ;;  %s156_s4 = sshll.u32 %s313_s6, 4  ;;  %s155_s20 = int_to_ptr.vmem [resolvable:$true] %s154_s20  ;;  %s157_s4 = int_to_ptr.hbm [resolvable:$true] %s156_s4 }
   0xb   :  { %103 = vperm.xlu2 %184, %v100_v13   ;;  %s218_s23 = smov 128   ;;  %s219_s24 = smov 8  }
   0xd   :  { %127 = vperm.xlu1 %183, %v122_v9  }
   0xf   :  { %v50_v28 = vld [vmem:[#allocation2] sm:$0xff] }
  0x10   :  { %v51_v32 = vld [vmem:[#allocation2 + $0x8] sm:$0xff] }
  0x13   :  { %106 = vperm.xlu2 %184, %v101_v15  }
  0x65   :  { %v104_v31 = vpop.permute.xlu2 %103 }
  0x66   :  { %vm108_vm9 = vcmp.eq.s32.totalorder %v104_v31, 1 }
  0x6d   :  { %v107_v41 = vpop.permute.xlu2 %106 }
  0x6e   :  { %vm109_vm11 = vcmp.eq.s32.totalorder %v107_v41, 1 }
  0x74   :  { %v40_v20 = vpop.permute.xlu0 %39 }
  0x75   :  { %vm44_vm5 = vcmp.eq.s32.totalorder %v40_v20, %v34_v17 }
  0x76   :  { %v168_v22 = vsel %vm44_vm5, 1.0, %v215_v11 }
  0x77   :  { %v125_v21 = vpop.permute.xlu1 %124  ;;  %170 = vmatmul.msk.f32.vlgmr.msra.gmra.mxu0 %vm28_vm2, %v168_v22 }
  0x78   :  { %vm129_vm6 = vcmp.eq.s32.totalorder %v125_v21, 1 }
  0x79   :  { %v133_v23 = vsel %vm129_vm6, %v185_v18, %v186_v19 }
  0x7a   :  { %137 = vrot.lane.b32.xlu0 %v133_v23, %s216_s1 }
  0x7c   :  { %v43_v24 = vpop.permute.xlu0 %42 }
  0x7d   :  { %vm45_vm7 = vcmp.eq.s32.totalorder %v43_v24, %v34_v17 }
  0x7e   :  { %v169_v26 = vsel %vm45_vm7, 1.0, %v215_v11 }
  0x7f   :  { %v128_v25 = vpop.permute.xlu1 %127  ;;  %171 = vmatmul.msk.f32.vlgmr.msra.gmra.mxu1 %vm28_vm2, %v169_v26 }
  0x80   :  { %vm130_vm8 = vcmp.eq.s32.totalorder %v128_v25, 1 }
  0x81   :  { %v134_v27 = vsel %vm130_vm8, %v185_v18, %v186_v19 }
  0x82   :  { %139 = vrot.lane.b32.xlu1 %v134_v27, %s216_s1 }
  0xec   :  { %v138_v36 = vpop.permute.xlu0 %137 }
  0xf4   :  { %v80_v29 = vpop.f32.mrf.mxu0  ;;  %v140_v44 = vpop.permute.xlu1 %139 }
  0xf5   :  { %v86_v30 = vadd.f32 %v80_v29, %v50_v28 }
  0xf7   :  { %88 = vst.msk [vmem:[#allocation2] sm:$0xff] %vm28_vm2, %v86_v30 }
  0xfc   :  { %v83_v34 = vpop.f32.mrf.mxu1 }
  0xfd   :  { %v87_v35 = vadd.f32 %v83_v34, %v51_v32 }
  0xfe   :  { %v93_v37 = vld [vmem:[#allocation2] sm:$0xff] }
  0xff   :  { %v113_v38 = vsel %vm108_vm9, %v187_v33, %v93_v37  ;;  %89 = vst.msk [vmem:[#allocation2 + $0x8] sm:$0xff] %vm28_vm2, %v87_v35 }
 0x100   :  { %v143_v39 = vsel %vm28_vm2, %v113_v38, %v138_v36 }
 0x101   :  { %v146_v40 = vsel %vm145_vm10, %v143_v39, 0.0 }
 0x102   :  { %148 = vst [vmem:[#allocation3] sm:$0xff] %v146_v40 }
 0x106   :  { %v94_v42 = vld [vmem:[#allocation2 + $0x8] sm:$0xff] }
 0x107   :  { %v114_v43 = vsel %vm109_vm11, %v187_v33, %v94_v42 }
 0x108   :  { %v144_v45 = vsel %vm28_vm2, %v114_v43, %v140_v44 }
 0x109   :  { %v147_v46 = vsel %vm145_vm10, %v144_v45, 0.0 }
 0x10a   :  { %149 = vst [vmem:[#allocation3 + $0x8] sm:$0xff] %v147_v46 }
 0x10b   :  { %162 = dma.vmem_to_hbm [thread:$0]  %s155_s20, 256, %s157_s4, [#allocation4], %s218_s23, %s218_s23, %s219_s24  }
 0x10c   :  { %212 = dma.done.wait [#allocation4], 256  }
 0x10d   :  { %213 = vsyncadd [#allocation4], 4294967040 }
 0x10e   :  { %167 = vsyncpa [#allocation4], 1 }

</bundles_post_ra>
